<compile_context>
chip_gen: v7x
topology: tpu7x:2x2x1
jax: 0.10.0
libtpu: 0.0.40
codegen_flags: <defaults>
</compile_context>

<pallas_src>
import jax
import jax.numpy as jnp
from jax.experimental import pallas as pl
from jax.experimental.pallas import tpu as pltpu


def _sobel_core(xb, top, bot):
    """|sobel_x| + |sobel_y| for one tile.

    xb : (bN, tH, W) f32 -- tile rows
    top: (bN, 1,  W) f32 -- image row just above the tile (zeros at image top)
    bot: (bN, 1,  W) f32 -- image row just below the tile (zeros at image bottom)
    """
    bN, tH, W = xb.shape
    col = jax.lax.broadcasted_iota(jnp.int32, (1, 1, W), 2)
    row = jax.lax.broadcasted_iota(jnp.int32, (1, tH, 1), 1)

    def d_s(a):
        # a[..., c-1] / a[..., c+1] with zero boundary (conv2d padding=1 on W):
        # lane rolls on the XLU + lane-index masks (no VMEM copies).
        al = pltpu.roll(a, shift=1, axis=2)        # wraps at column 0
        ar = pltpu.roll(a, shift=W - 1, axis=2)    # wraps at column W-1
        al = jnp.where(col == 0, 0.0, al)
        ar = jnp.where(col == W - 1, 0.0, ar)
        # Separable Sobel:  D = x[c+1] - x[c-1],  S = x[c-1] + 2 x[c] + x[c+1]
        return ar - al, al + 2.0 * a + ar

    d, s = d_s(xb)
    d_t, s_t = d_s(top)
    d_b, s_b = d_s(bot)

    # Vertical neighbours via sublane rolls; the wrapped edge rows are replaced
    # by the (already zero-masked) halo rows with single where-selects.
    d_up = jnp.where(row == 0, d_t, pltpu.roll(d, shift=1, axis=1))
    d_dn = jnp.where(row == tH - 1, d_b, pltpu.roll(d, shift=tH - 1, axis=1))
    s_up = jnp.where(row == 0, s_t, pltpu.roll(s, shift=1, axis=1))
    s_dn = jnp.where(row == tH - 1, s_b, pltpu.roll(s, shift=tH - 1, axis=1))

    gx = d_up + 2.0 * d + d_dn        # Gx[r] = D[r-1] + 2 D[r] + D[r+1]
    gy = s_up - s_dn                  # Gy[r] = S[r-1] - S[r+1]
    return jnp.abs(gx) + jnp.abs(gy)


def _kernel_single_tile(x_ref, o_ref):
    """Whole image height in one block: both conv padding rows are plain zeros."""
    bN, tH, W = x_ref.shape
    xb = x_ref[...].astype(jnp.float32)
    zrow = jnp.zeros((bN, 1, W), jnp.float32)
    o_ref[...] = _sobel_core(xb, zrow, zrow).astype(o_ref.dtype)


def _kernel_row_tiled(x_ref, top_ref, bot_ref, o_ref):
    """Row-tiled variant: 1-row halos come from clamped 8-row blocks."""
    i = pl.program_id(1)
    n_rt = pl.num_programs(1)
    bN, tH, W = x_ref.shape
    hr = top_ref.shape[1]

    xb = x_ref[...].astype(jnp.float32)
    zrow = jnp.zeros((bN, 1, W), jnp.float32)
    top = top_ref[:, hr - 1:hr, :].astype(jnp.float32)   # row  i*tH - 1
    bot = bot_ref[:, 0:1, :].astype(jnp.float32)         # row (i+1)*tH
    # where-select (NOT multiply-by-zero) so inf/NaN in neighbouring rows can
    # never leak into the conv zero padding.
    top = jnp.where(i == 0, zrow, top)
    bot = jnp.where(i == n_rt - 1, zrow, bot)
    o_ref[...] = _sobel_core(xb, top, bot).astype(o_ref.dtype)


def _choose_tiling(N, H, W, itemsize, target_bytes):
    """Pick (batch_per_block, rows_per_block)."""
    # Rows per tile: biggest divisor of H (multiple of 8) that fits the budget
    # (ordering biases toward tH >= 256 so the 2x8-row halo reads stay <~6%).
    tH = H
    if H % 8 == 0 and H * W * itemsize > target_bytes:
        for cand in (1024, 512, 256, 128, 64, 32, 16, 8):
            if cand < H and H % cand == 0 and (
                    cand * W * itemsize <= target_bytes or cand == 8):
                tH = cand
                break
    # TODO(synk): very large images with H % 8 != 0 fall back to a full-height
    # block; a pl.cdiv ragged grid with edge masking would bound VMEM there.
    bN = 1
    if tH == H:  # small images: fold batch elements into one block
        per_image = max(H * W * itemsize, 1)
        cap = max(1, target_bytes // per_image)
        cap = min(cap, N)
        if N >= 2:
            cap = min(cap, N // 2)   # keep >= 2 grid steps (v7x: 2 TensorCores)
        for cand in range(cap, 0, -1):
            if N % cand == 0:
                bN = cand
                break
    return bN, tH


def sobelxy(x, *, target_block_bytes=2 << 20):
    """x: (N,1,H,W) -> |conv2d(x,Kx,padding=1)| + |conv2d(x,Ky,padding=1)|."""
    N, C, H, W = x.shape
    assert C == 1, "Sobelxy uses (1,1,3,3) conv weights => in_channels must be 1"
    x2 = x.reshape(N, H, W)                      # no pad / no dtype copy in HBM
    itemsize = jnp.dtype(x2.dtype).itemsize

    bN, tH = _choose_tiling(N, H, W, itemsize, target_block_bytes)
    n_b = N // bN
    n_rt = H // tH

    # VMEM budget derived from the footprint (double-buffered in/out blocks,
    # halo blocks, f32 in-kernel intermediates), capped at 32 MiB (v7x-safe).
    blk = bN * tH * W
    io_bytes = 2 * 2 * blk * itemsize
    halo_bytes = (2 * 2 * bN * 8 * W * itemsize) if n_rt > 1 else 0
    scratch_bytes = 10 * blk * 4
    vmem_limit = int(min(max(io_bytes + halo_bytes + scratch_bytes + (2 << 20),
                             16 << 20), 32 << 20))

    if n_rt == 1:
        # Single row-tile: no halo inputs, no dead DMA / masking work.
        grid_spec = pltpu.PrefetchScalarGridSpec(
            num_scalar_prefetch=0,
            grid=(n_b,),
            in_specs=[pl.BlockSpec((bN, H, W), lambda b: (b, 0, 0))],
            out_specs=pl.BlockSpec((bN, H, W), lambda b: (b, 0, 0)),
        )
        kernel = _kernel_single_tile
        operands = (x2,)
        dim_sem = ("parallel",)
    else:
        rpb = tH // 8                 # 8-row halo blocks per main row tile
        last_blk = H // 8 - 1
        grid_spec = pltpu.PrefetchScalarGridSpec(
            num_scalar_prefetch=0,
            grid=(n_b, n_rt),
            in_specs=[
                # Main tile (lane-dense, width exactly W).
                pl.BlockSpec((bN, tH, W), lambda b, i: (b, i, 0)),
                # 8-row block holding the row just above the tile (clamped at
                # the image top; its content is replaced by zeros when i == 0).
                pl.BlockSpec((bN, 8, W),
                             lambda b, i: (b, jnp.maximum(i * rpb - 1, 0), 0)),
                # 8-row block holding the row just below the tile (clamped at
                # the image bottom; replaced by zeros when i == n_rt - 1).
                pl.BlockSpec((bN, 8, W),
                             lambda b, i: (b, jnp.minimum((i + 1) * rpb, last_blk), 0)),
            ],
            out_specs=pl.BlockSpec((bN, tH, W), lambda b, i: (b, i, 0)),
        )
        kernel = _kernel_row_tiled
        operands = (x2, x2, x2)
        dim_sem = ("parallel", "parallel")

    out = pl.pallas_call(
        kernel,
        out_shape=jax.ShapeDtypeStruct((N, H, W), x2.dtype),
        grid_spec=grid_spec,
        compiler_params=pltpu.CompilerParams(
            dimension_semantics=dim_sem,
            vmem_limit_bytes=vmem_limit,
        ),
    )(*operands)
    return out.reshape(N, 1, H, W)


def _sobelxy_ref(x):
    """Pure-JAX reference (same math as the PyTorch module, NCHW, C=1)."""
    kx = jnp.array([[-1., 0., 1.], [-2., 0., 2.], [-1., 0., 1.]], jnp.float32)
    ky = jnp.array([[1., 2., 1.], [0., 0., 0.], [-1., -2., -1.]], jnp.float32)
    kx = kx.reshape(1, 1, 3, 3)
    ky = ky.reshape(1, 1, 3, 3)
    dn = ("NCHW", "OIHW", "NCHW")
    xf = x.astype(jnp.float32)
    gx = jax.lax.conv_general_dilated(xf, kx, (1, 1), ((1, 1), (1, 1)),
                                      dimension_numbers=dn)
    gy = jax.lax.conv_general_dilated(xf, ky, (1, 1), ((1, 1), (1, 1)),
                                      dimension_numbers=dn)
    return (jnp.abs(gx) + jnp.abs(gy)).astype(x.dtype)


if __name__ == "__main__":
    # The module's forward implies NCHW with C == 1 (conv weights are (1,1,3,3)).
    x = jax.random.normal(jax.random.PRNGKey(0), (2, 1, 16, 16), dtype=jnp.float32)
    y = jax.block_until_ready(sobelxy(x))
    assert y.shape == x.shape
    assert jnp.allclose(y, _sobelxy_ref(x), atol=1e-4, rtol=1e-4)

    # Exercise the row-tiled (halo) path with a tiny per-block budget.
    x_big = jax.random.normal(jax.random.PRNGKey(1), (1, 1, 64, 128),
                              dtype=jnp.float32)
    y_big = jax.block_until_ready(sobelxy(x_big, target_block_bytes=4096))
    assert jnp.allclose(y_big, _sobelxy_ref(x_big), atol=1e-4, rtol=1e-4)

    print("KERNEL_OK")
</pallas_src>

<mosaic_0001>
module attributes {stable_mosaic.version = 11 : i64} {
  func.func @_kernel_single_tile(%arg0: i32, %arg1: memref<1x16x16xf32, #tpu.memory_space<vmem>>, %arg2: memref<1x16x16xf32, #tpu.memory_space<vmem>>) attributes {dimension_semantics = [#tpu.dimension_semantics<parallel>], iteration_bounds = array<i64: 2>, scalar_prefetch = 0 : i64, scratch_operands = 0 : i64, tpu.core_type = #tpu.core_type<tc>, window_params = [{transform_indices = @transform_0, window_bounds = array<i64: 1, 16, 16>}, {transform_indices = @transform_1, window_bounds = array<i64: 1, 16, 16>}]} {
    %c0 = arith.constant 0 : index
    %c0_0 = arith.constant 0 : index
    %c0_1 = arith.constant 0 : index
    %0 = vector.load %arg1[%c0, %c0_0, %c0_1] : memref<1x16x16xf32, #tpu.memory_space<vmem>>, vector<1x16x16xf32>
    %cst = arith.constant 0.000000e+00 : f32
    %1 = vector.broadcast %cst : f32 to vector<1x1x16xf32>
    %2 = tpu.iota {dimensions = array<i32: 2>} : vector<1x1x16xi32>
    %3 = tpu.iota {dimensions = array<i32: 1>} : vector<1x16x1xi32>
    %c1_i32 = arith.constant 1 : i32
    %4 = tpu.dynamic_rotate %0 by %c1_i32 dim 2 : vector<1x16x16xf32>, i32 -> vector<1x16x16xf32>
    %c15_i32 = arith.constant 15 : i32
    %5 = tpu.dynamic_rotate %0 by %c15_i32 dim 2 : vector<1x16x16xf32>, i32 -> vector<1x16x16xf32>
    %c0_i32 = arith.constant 0 : i32
    %6 = vector.broadcast %c0_i32 : i32 to vector<1x1x16xi32>
    %7 = arith.cmpi eq, %2, %6 : vector<1x1x16xi32>
    %cst_2 = arith.constant 0.000000e+00 : f32
    %8 = vector.shape_cast %7 : vector<1x1x16xi1> to vector<1x1x16xi1>
    %9 = vector.broadcast %8 : vector<1x1x16xi1> to vector<1x16x16xi1>
    %10 = vector.broadcast %cst_2 : f32 to vector<1x16x16xf32>
    %11 = arith.select %9, %10, %4 : vector<1x16x16xi1>, vector<1x16x16xf32>
    %c15_i32_3 = arith.constant 15 : i32
    %12 = vector.broadcast %c15_i32_3 : i32 to vector<1x1x16xi32>
    %13 = arith.cmpi eq, %2, %12 : vector<1x1x16xi32>
    %cst_4 = arith.constant 0.000000e+00 : f32
    %14 = vector.shape_cast %13 : vector<1x1x16xi1> to vector<1x1x16xi1>
    %15 = vector.broadcast %14 : vector<1x1x16xi1> to vector<1x16x16xi1>
    %16 = vector.broadcast %cst_4 : f32 to vector<1x16x16xf32>
    %17 = arith.select %15, %16, %5 : vector<1x16x16xi1>, vector<1x16x16xf32>
    %18 = arith.subf %17, %11 : vector<1x16x16xf32>
    %cst_5 = arith.constant 2.000000e+00 : f32
    %19 = vector.broadcast %cst_5 : f32 to vector<1x16x16xf32>
    %20 = arith.mulf %19, %0 : vector<1x16x16xf32>
    %21 = arith.addf %11, %20 : vector<1x16x16xf32>
    %22 = arith.addf %21, %17 : vector<1x16x16xf32>
    %c1_i32_6 = arith.constant 1 : i32
    %23 = tpu.dynamic_rotate %1 by %c1_i32_6 dim 2 : vector<1x1x16xf32>, i32 -> vector<1x1x16xf32>
    %c15_i32_7 = arith.constant 15 : i32
    %24 = tpu.dynamic_rotate %1 by %c15_i32_7 dim 2 : vector<1x1x16xf32>, i32 -> vector<1x1x16xf32>
    %c0_i32_8 = arith.constant 0 : i32
    %25 = vector.broadcast %c0_i32_8 : i32 to vector<1x1x16xi32>
    %26 = arith.cmpi eq, %2, %25 : vector<1x1x16xi32>
    %cst_9 = arith.constant 0.000000e+00 : f32
    %27 = vector.broadcast %cst_9 : f32 to vector<1x1x16xf32>
    %28 = arith.select %26, %27, %23 : vector<1x1x16xi1>, vector<1x1x16xf32>
    %c15_i32_10 = arith.constant 15 : i32
    %29 = vector.broadcast %c15_i32_10 : i32 to vector<1x1x16xi32>
    %30 = arith.cmpi eq, %2, %29 : vector<1x1x16xi32>
    %cst_11 = arith.constant 0.000000e+00 : f32
    %31 = vector.broadcast %cst_11 : f32 to vector<1x1x16xf32>
    %32 = arith.select %30, %31, %24 : vector<1x1x16xi1>, vector<1x1x16xf32>
    %33 = arith.subf %32, %28 : vector<1x1x16xf32>
    %cst_12 = arith.constant 2.000000e+00 : f32
    %34 = vector.broadcast %cst_12 : f32 to vector<1x1x16xf32>
    %35 = arith.mulf %34, %1 : vector<1x1x16xf32>
    %36 = arith.addf %28, %35 : vector<1x1x16xf32>
    %37 = arith.addf %36, %32 : vector<1x1x16xf32>
    %c1_i32_13 = arith.constant 1 : i32
    %38 = tpu.dynamic_rotate %1 by %c1_i32_13 dim 2 : vector<1x1x16xf32>, i32 -> vector<1x1x16xf32>
    %c15_i32_14 = arith.constant 15 : i32
    %39 = tpu.dynamic_rotate %1 by %c15_i32_14 dim 2 : vector<1x1x16xf32>, i32 -> vector<1x1x16xf32>
    %c0_i32_15 = arith.constant 0 : i32
    %40 = vector.broadcast %c0_i32_15 : i32 to vector<1x1x16xi32>
    %41 = arith.cmpi eq, %2, %40 : vector<1x1x16xi32>
    %cst_16 = arith.constant 0.000000e+00 : f32
    %42 = vector.broadcast %cst_16 : f32 to vector<1x1x16xf32>
    %43 = arith.select %41, %42, %38 : vector<1x1x16xi1>, vector<1x1x16xf32>
    %c15_i32_17 = arith.constant 15 : i32
    %44 = vector.broadcast %c15_i32_17 : i32 to vector<1x1x16xi32>
    %45 = arith.cmpi eq, %2, %44 : vector<1x1x16xi32>
    %cst_18 = arith.constant 0.000000e+00 : f32
    %46 = vector.broadcast %cst_18 : f32 to vector<1x1x16xf32>
    %47 = arith.select %45, %46, %39 : vector<1x1x16xi1>, vector<1x1x16xf32>
    %48 = arith.subf %47, %43 : vector<1x1x16xf32>
    %cst_19 = arith.constant 2.000000e+00 : f32
    %49 = vector.broadcast %cst_19 : f32 to vector<1x1x16xf32>
    %50 = arith.mulf %49, %1 : vector<1x1x16xf32>
    %51 = arith.addf %43, %50 : vector<1x1x16xf32>
    %52 = arith.addf %51, %47 : vector<1x1x16xf32>
    %c0_i32_20 = arith.constant 0 : i32
    %53 = vector.broadcast %c0_i32_20 : i32 to vector<1x16x1xi32>
    %54 = arith.cmpi eq, %3, %53 : vector<1x16x1xi32>
    %c1_i32_21 = arith.constant 1 : i32
    %55 = tpu.dynamic_rotate %18 by %c1_i32_21 dim 1 : vector<1x16x16xf32>, i32 -> vector<1x16x16xf32>
    %56 = vector.shape_cast %54 : vector<1x16x1xi1> to vector<1x16x1xi1>
    %57 = vector.broadcast %56 : vector<1x16x1xi1> to vector<1x16x16xi1>
    %58 = vector.shape_cast %33 : vector<1x1x16xf32> to vector<1x1x16xf32>
    %59 = vector.broadcast %58 : vector<1x1x16xf32> to vector<1x16x16xf32>
    %60 = arith.select %57, %59, %55 : vector<1x16x16xi1>, vector<1x16x16xf32>
    %c15_i32_22 = arith.constant 15 : i32
    %61 = vector.broadcast %c15_i32_22 : i32 to vector<1x16x1xi32>
    %62 = arith.cmpi eq, %3, %61 : vector<1x16x1xi32>
    %c15_i32_23 = arith.constant 15 : i32
    %63 = tpu.dynamic_rotate %18 by %c15_i32_23 dim 1 : vector<1x16x16xf32>, i32 -> vector<1x16x16xf32>
    %64 = vector.shape_cast %62 : vector<1x16x1xi1> to vector<1x16x1xi1>
    %65 = vector.broadcast %64 : vector<1x16x1xi1> to vector<1x16x16xi1>
    %66 = vector.shape_cast %48 : vector<1x1x16xf32> to vector<1x1x16xf32>
    %67 = vector.broadcast %66 : vector<1x1x16xf32> to vector<1x16x16xf32>
    %68 = arith.select %65, %67, %63 : vector<1x16x16xi1>, vector<1x16x16xf32>
    %c0_i32_24 = arith.constant 0 : i32
    %69 = vector.broadcast %c0_i32_24 : i32 to vector<1x16x1xi32>
    %70 = arith.cmpi eq, %3, %69 : vector<1x16x1xi32>
    %c1_i32_25 = arith.constant 1 : i32
    %71 = tpu.dynamic_rotate %22 by %c1_i32_25 dim 1 : vector<1x16x16xf32>, i32 -> vector<1x16x16xf32>
    %72 = vector.shape_cast %70 : vector<1x16x1xi1> to vector<1x16x1xi1>
    %73 = vector.broadcast %72 : vector<1x16x1xi1> to vector<1x16x16xi1>
    %74 = vector.shape_cast %37 : vector<1x1x16xf32> to vector<1x1x16xf32>
    %75 = vector.broadcast %74 : vector<1x1x16xf32> to vector<1x16x16xf32>
    %76 = arith.select %73, %75, %71 : vector<1x16x16xi1>, vector<1x16x16xf32>
    %c15_i32_26 = arith.constant 15 : i32
    %77 = vector.broadcast %c15_i32_26 : i32 to vector<1x16x1xi32>
    %78 = arith.cmpi eq, %3, %77 : vector<1x16x1xi32>
    %c15_i32_27 = arith.constant 15 : i32
    %79 = tpu.dynamic_rotate %22 by %c15_i32_27 dim 1 : vector<1x16x16xf32>, i32 -> vector<1x16x16xf32>
    %80 = vector.shape_cast %78 : vector<1x16x1xi1> to vector<1x16x1xi1>
    %81 = vector.broadcast %80 : vector<1x16x1xi1> to vector<1x16x16xi1>
    %82 = vector.shape_cast %52 : vector<1x1x16xf32> to vector<1x1x16xf32>
    %83 = vector.broadcast %82 : vector<1x1x16xf32> to vector<1x16x16xf32>
    %84 = arith.select %81, %83, %79 : vector<1x16x16xi1>, vector<1x16x16xf32>
    %cst_28 = arith.constant 2.000000e+00 : f32
    %85 = vector.broadcast %cst_28 : f32 to vector<1x16x16xf32>
    %86 = arith.mulf %85, %18 : vector<1x16x16xf32>
    %87 = arith.addf %60, %86 : vector<1x16x16xf32>
    %88 = arith.addf %87, %68 : vector<1x16x16xf32>
    %89 = arith.subf %76, %84 : vector<1x16x16xf32>
    %90 = math.absf %88 : vector<1x16x16xf32>
    %91 = math.absf %89 : vector<1x16x16xf32>
    %92 = arith.addf %90, %91 : vector<1x16x16xf32>
    %c0_29 = arith.constant 0 : index
    %c0_30 = arith.constant 0 : index
    %c0_31 = arith.constant 0 : index
    %93 = vector.load %arg2[%c0_29, %c0_30, %c0_31] : memref<1x16x16xf32, #tpu.memory_space<vmem>>, vector<1x16x16xf32>
    tpu.vector_store %arg2[%c0_29, %c0_30, %c0_31], %92 {strides = array<i32>} : memref<1x16x16xf32, #tpu.memory_space<vmem>>, vector<1x16x16xf32>,
    return
  }
  func.func @transform_0(%arg0: i32) -> (i32, i32, i32) {
    %c0_i32 = arith.constant 0 : i32
    %c0_i32_0 = arith.constant 0 : i32
    %c0_i32_1 = arith.constant 0 : i32
    return %arg0, %c0_i32, %c0_i32_0 : i32, i32, i32
  }
  func.func @transform_1(%arg0: i32) -> (i32, i32, i32) {
    %c0_i32 = arith.constant 0 : i32
    %c0_i32_0 = arith.constant 0 : i32
    %c0_i32_1 = arith.constant 0 : i32
    return %arg0, %c0_i32, %c0_i32_0 : i32, i32, i32
  }
}

</mosaic_0001>

<bundles_post_ra>
// kernel: tpu_custom_call.1
= control target key start
LH: loop header
LB: loop body
LE: loop exit
PB: predicated region body
PF: predicated region fallthrough
CT: control target
= control target key end

     0   :  { %6 = vsyncpa [#allocation3], 0  ;;  %s731_s0 = inlined_call_operand.hbm [shape: f32[2,16,16], index: 0, kind: input, shape index: {}]   ;;  %s732_s1 = inlined_call_operand.hbm [shape: f32[2,16,16], index: 1, kind: output, shape index: {}]  }
   0x1   :  { %8 = vsyncpa [#allocation3 + $0x1], 0 }
   0x2   :  { %9 = vsyncpa [#allocation4], 0 }
   0x3   :  { %11 = vsyncpa [#allocation4 + $0x1], 0  ;;  %s543_s6 = smov 0   ;;  %s545_s7 = smov 0  }
   0x4   :  { %s547_s8 = smov 0   ;;  %s549_s9 = smov 0  }
   0x5 LB: > { %s564_s10 = sadd.s32 4294967295, %s521_s9   ;;  %s355_s11 = sadd.s32 4294967294, %s521_s9   ;;  %s521_s9 = sphi %s549_s9, %s745_s9   ;;  %s517_s8 = sphi %s547_s8, %s744_s8   ;;  %s513_s7 = sphi %s545_s7, %s743_s7   ;;  %s509_s6 = sphi %s543_s6, %s742_s6  }
   0x6   : > { %s568_s12 = sadd.s32 1, %s521_s9   ;;  %s24_s13 = sadd.s32 1, %s517_s8 }
   0x7   : > { %s21_s14 = ssub.s32 %s521_s9, %s568_s12  ;;  %p31_p0 = scmp.ne.s32.totalorder %s517_s8, %s513_s7 }
   0x8   : > { %p22_p1 = scmp.eq.s32.totalorder %s21_s14, 0  ;;  %p32_p2 = scmp.eq.s32.totalorder %s521_s9, 0 }
   0x9   : > { %p37_p3 = scmp.ne.s32.totalorder %s513_s7, %s509_s6  ;;  %p38_p4 = scmp.eq.s32.totalorder %s564_s10, 0 }
   0xa   : > { %s580_s15 = scalar_select %p22_p1, %s517_s8, %s24_s13  }
   0xb   : > { %p582_p5 = por %p32_p2, %p31_p0  ;;  %p586_p6 = por %p38_p4, %p37_p3 }
   0xc   : > { %p61_p7 = scmp.eq.s32.totalorder %s564_s10, 1  ;;  %p67_p8 = scmp.eq.s32.totalorder %s355_s11, 1 }
   0xd   : > { %p383_p10 = scmp.lt.s32.totalorder %s521_s9, 2  ;;  %s87_s20 = sand.u32 1, %s517_s8  }
   0xe   : > { %p593_p11 = por %p61_p7, %p31_p0  ;;  %p597_p12 = por %p67_p8, %p37_p3 }
   0xf   : > { %s369_s21 = sshll.u32 %s521_s9, 8  ;;  %s358_s22 = sshll.u32 %s87_s20, 4 }
  0x10   : > { %s736_s18 = scalar_select %p593_p11, 1, 0 }
  0x11   : > { %s737_s19 = scalar_select %p597_p12, 1, 0 }
  0x12   : > { %s606_s25 = scalar_lea.hbm %s731_s0, %s369_s21  ;;  %s91_s26 = scalar_lea.vmem [#allocation2], %s358_s22 }
  0x13   : > { %s98_s27 = sshll.u32 %s91_s26, 4  ;;  %p610_p13 = pnand %p383_p10, %p582_p5  ;;  %s614_s27 = int_to_ptr.vmem [resolvable:$true] %s98_s27 }
  0x14   : > { %s616_s29 = scalar_lea.sflag [#allocation3], %s87_s20  ;;  %s425_s30 = scalar_lea.hbm %s606_s25, 256 }
  0x15   : > { %p426_p0 = scmp.ne.s32.totalorder %s606_s25, %s425_s30  ;;  %p427_p1 = pneg %p610_p13 }
  0x16   : > { %s430_s4 = scalar_lea.hbm %s731_s0, 512  ;;  %p431_p4 = scmp.lt.u32.totalorder %s606_s25, %s731_s0 }
  0x17   : > { %p428_p2 = pnand %p427_p1, %p426_p0  ;;  %p432_p5 = scmp.lt.u32.totalorder %s430_s4, %s425_s30 }
  0x18   : > { %p434_p8 = scmp.lt.u32.totalorder %s425_s30, %s606_s25 }
  0x19   : > { %p429_p3 = pneg %p428_p2  ;;  %p433_p7 = por %p432_p5, %p431_p4 }
  0x1b   : > { %p435_p10 = por %p434_p8, %p433_p7 }
  0x1d   : > { %p436_p9 = pnand %p435_p10, %p429_p3 }
  0x1f   : > { %439 = shalt.err (!%p436_p9)
}
  0x20   : > { %s440_s13 = scalar_lea.vmem %s614_s27, 256  ;;  %s523_s14 = smov [#allocation2]  }
  0x21   : > { %p441_p0 = scmp.ne.s32.totalorder %s614_s27, %s440_s13  ;;  %s445_s16 = sshll.u32 %s523_s14, 4  ;;  %s446_s16 = int_to_ptr.vmem [resolvable:$false] %s445_s16 }
  0x22   : > { %s447_s20 = scalar_lea.vmem %s446_s16, 512  ;;  %p448_p11 = scmp.lt.s32.totalorder %s614_s27, %s446_s16 }
  0x23   : > { %p443_p2 = pnand %p441_p0, %p427_p1  ;;  %p449_p4 = scmp.lt.s32.totalorder %s447_s20, %s440_s13 }
  0x25   : > { %p444_p12 = pneg %p443_p2  ;;  %p450_p5 = por %p449_p4, %p448_p11 }
  0x27   : > { %p451_p7 = pnand %p450_p5, %p444_p12 }
  0x29   : > { %454 = shalt.err (!%p451_p7)
}
  0x2a   : > { %s524_s21 = smov 128   ;;  %s525_s22 = smov 8  }
  0x2b   : > { %378 = dma.hbm_to_vmem [thread:$0]  (!%p610_p13), %s606_s25, 256, %s614_s27, %s616_s29, %s524_s21, %s524_s21, %s525_s22  }
  0x2c   : > { %p361_p9 = scmp.ge.s32.totalorder %s521_s9, 1  ;;  %p106_p1 = scmp.lt.s32.totalorder %s521_s9, 3 }
  0x2e   : > { %p107_p3 = pnand %p361_p9, %p106_p1 }
  0x2f   : > { %s647_s23 = sand.u32 (!%p107_p3), 1, %s513_s7  }
  0x30   : > { %110 = sbr.rel (%p107_p3) target bundleno = 445 (0x1bd), region = 24  ;;  %s362_s24 = sshll.u32 (!%p107_p3), %s647_s23, 4 }
  0x31   : > { %s113_s26 = scalar_lea.sflag (!%p107_p3), [#allocation3], %s647_s23  ;;  %s116_s30 = scalar_lea.vmem (!%p107_p3), [#allocation2], %s362_s24 }
  0x37   : > { %500 = dma.done.wait (%p586_p6), %s113_s26, 256  }
  0x38   : > { %502 = vsyncadd (%p586_p6), %s113_s26, 4294967040  ;;  %v526_v0 = vmov 0.0   ;;  %s527_s25 = smov 16   ;;  %v135_v1 = vld [vmem:[%s116_s30] sm:$0xff]  ;;  %v136_v2 = vld [vmem:[%s116_s30 + $0x8] sm:$0xff]  ;;  %vm142_vm0 = vcmask 1047680   ;;  %v137_v15 = vlaneseq }
  0x39   : > { %187 = vrot.lane.b32.xlu1 %v526_v0, %s527_s25  ;;  %143 = vrot.lane.b32.xlu0 %v135_v1, %s527_s25  ;;  %s528_s17 = smov 113   ;;  %s529_s27 = smov 127   ;;  %v182_v18 = vmul.f32 2.0, %v136_v2  ;;  %v181_v21 = vmul.f32 2.0, %v135_v1  ;;  %vm265_vm7 = vcmask 130048  }
  0x3a   : > { %v138_v16 = vand.u32 127, %v137_v15  ;;  %v140_v25 = vshrl.u32 %v137_v15, 7  ;;  %s370_s28 = sshll.u32 %s564_s10, 8  ;;  %s134_s29 = scalar_lea.vmem [#allocation5], %s362_s24 }
  0x3b   : > { %s282_s2 = sshll.u32 %s134_s29, 4  ;;  %s685_s5 = scalar_lea.hbm %s732_s1, %s370_s28  ;;  %s687_s2 = int_to_ptr.vmem [resolvable:$true] %s282_s2 }
  0x3c   : > { %vm155_vm1 = vcmp.eq.s32.totalorder %v138_v16, 0  ;;  %vm168_vm2 = vcmp.eq.s32.totalorder %v138_v16, 15  ;;  %vm209_vm3 = vcmp.lt.s32.totalorder %v140_v25, 1  ;;  %v141_v39 = vadd.s32 8, %v140_v25  ;;  %s269_s10 = scalar_lea.sflag [#allocation4], %s647_s23  ;;  %s455_s11 = scalar_lea.vmem %s687_s2, 256 }
  0x3d   : > { %146 = vrot.lane.b32.xlu0 %v136_v2, %s527_s25  ;;  %vm226_vm4 = vcmp.lt.s32.totalorder %v140_v25, 7  ;;  %v218_v43 = vsub.s32 0, %v140_v25  ;;  %vm205_vm5 = vcmp.eq.s32.totalorder %v140_v25, 0  ;;  %p456_p6 = scmp.ne.s32.totalorder %s687_s2, %s455_s11  ;;  %p739_p11 = scmp.ne.s32.totalorder %s736_s18, 0 }
  0x3e   : > { %vm223_vm6 = vcmp.eq.s32.totalorder %v141_v39, 15  ;;  %s530_s13 = smov [#allocation5]  }
  0x3f   : > { %p457_p12 = pnand %p456_p6, %p739_p11  ;;  %s459_s14 = sshll.u32 %s530_s13, 4  ;;  %s460_s14 = int_to_ptr.vmem [resolvable:$false] %s459_s14 }
  0x40   : > { %s461_s16 = scalar_lea.vmem %s460_s14, 512  ;;  %p462_p8 = scmp.lt.s32.totalorder %s687_s2, %s460_s14 }
  0x41   : > { %p458_p13 = pneg %p457_p12  ;;  %p463_p10 = scmp.lt.s32.totalorder %s461_s16, %s455_s11 }
  0x43   : > { %p464_p0 = por %p463_p10, %p462_p8 }
  0x45   : > { %p465_p2 = pnand %p464_p0, %p458_p13 }
  0xab   : > { %v144_v3 = vpop.permute.xlu0 %143  ;;  %v188_v4 = vpop.permute.xlu1 %187 }
  0xac   : > { %v145_v5 = vsel %vm142_vm0, %v144_v3, %v135_v1  ;;  %v189_v6 = vsel %vm142_vm0, %v188_v4, 0.0 }
  0xad   : > { %149 = vrot.lane.b32.xlu1 %v145_v5, %s527_s25 }
  0xaf   : > { %v147_v7 = vpop.permute.xlu0 %146 }
  0xb0   : > { %v148_v8 = vsel %vm142_vm0, %v147_v7, %v136_v2 }
  0xb1   : > { %151 = vrot.lane.b32.xlu0 %v148_v8, %s527_s25  ;;  %190 = vrot.lane.b32.xlu1 %v189_v6, %s527_s25 }
 0x11f   : > { %v150_v9 = vpop.permute.xlu1 %149 }
 0x120   : > { %v153_v10 = vsel %vm142_vm0, %v150_v9, %v135_v1 }
 0x121   : > { %160 = vrot.lane.b32.xlu0 %v153_v10, %s528_s17 }
 0x123   : > { %v152_v11 = vpop.permute.xlu0 %151  ;;  %v191_v12 = vpop.permute.xlu1 %190 }
 0x124   : > { %v154_v13 = vsel %vm142_vm0, %v152_v11, %v136_v2  ;;  %v192_v14 = vsel %vm142_vm0, %v191_v12, 0.0 }
 0x125   : > { %171 = vrot.lane.b32.xlu0 %v153_v10, %s529_s27  ;;  %162 = vrot.lane.b32.xlu1 %v154_v13, %s528_s17 }
 0x129   : > { %173 = vrot.lane.b32.xlu1 %v154_v13, %s529_s27  ;;  %194 = vrot.lane.b32.xlu0 %v192_v14, %s528_s17 }
 0x12d   : > { %198 = vrot.lane.b32.xlu1 %v192_v14, %s529_s27 }
 0x193   : > { %v161_v17 = vpop.permute.xlu0 %160 }
 0x194   : > { %v166_v23 = vsel %vm155_vm1, 0.0, %v161_v17 }
 0x195   : > { %v183_v28 = vadd.f32 %v181_v21, %v166_v23 }
 0x197   : > { %v163_v19 = vpop.permute.xlu1 %162  ;;  %v172_v20 = vpop.permute.xlu0 %171 }
 0x198   : > { %v167_v22 = vsel %vm155_vm1, 0.0, %v163_v19  ;;  %v177_v24 = vsel %vm168_vm2, 0.0, %v172_v20 }
 0x199   : > { %v184_v26 = vadd.f32 %v182_v18, %v167_v22  ;;  %v179_v30 = vsub.f32 %v177_v24, %v166_v23  ;;  %v185_v34 = vadd.f32 %v183_v28, %v177_v24 }
 0x19b   : > { %v174_v27 = vpop.permute.xlu1 %173  ;;  %v195_v33 = vpop.permute.xlu0 %194  ;;  %v207_v41 = vrot.slane %v179_v30, 7  ;;  %v235_v44 = vrot.slane %v185_v34, 7  ;;  %v245_v47 = vrot.slane %v185_v34, 1  ;;  %v224_v51 = vrot.slane %v179_v30, 1 }
 0x19c   : > { %v178_v29 = vsel %vm168_vm2, 0.0, %v174_v27  ;;  %v197_v40 = vsel %vm155_vm1, 0.0, %v195_v33  ;;  %v251_v52 = vmul.f32 2.0, %v179_v30 }
 0x19d   : > { %v180_v31 = vsub.f32 %v178_v29, %v167_v22  ;;  %v186_v32 = vadd.f32 %v184_v26, %v178_v29 }
 0x19f   : > { %v208_v35 = vrot.slane %v180_v31, 7  ;;  %v199_v36 = vpop.permute.xlu1 %198  ;;  %v236_v37 = vrot.slane %v186_v32, 7  ;;  %v246_v42 = vrot.slane %v186_v32, 1  ;;  %v225_v45 = vrot.slane %v180_v31, 1 }
 0x1a0   : > { %v201_v38 = vsel %vm168_vm2, 0.0, %v199_v36  ;;  %v252_v46 = vmul.f32 2.0, %v180_v31 }
 0x1a1   : > { %v210_v48 = vsel %vm209_vm3, %v207_v41, %v208_v35  ;;  %v202_v49 = vsub.f32 %v201_v38, %v197_v40  ;;  %v204_v50 = vadd.f32 %v201_v38, %v197_v40  ;;  %v237_v53 = vsel %vm209_vm3, %v235_v44, %v236_v37 }
 0x1a2   : > { %v238_v54 = vsel %vm209_vm3, %v236_v37, %v235_v44  ;;  %v247_v55 = vsel %vm226_vm4, %v245_v47, %v246_v42  ;;  %v248_v58 = vsel %vm226_vm4, %v246_v42, %v245_v47  ;;  %v254_v59 = vadd.f32 %v252_v46, %v210_v48 }
 0x1a3   : > { %v219_v56 = vrot.slane %v202_v49, %v218_v43  ;;  %v242_v57 = vrot.slane %v204_v50, %v218_v43  ;;  %v211_v60 = vsel %vm209_vm3, %v208_v35, %v207_v41  ;;  %v228_v61 = vsel %vm226_vm4, %v225_v45, %v224_v51 }
 0x1a4   : > { %v227_v6 = vsel %vm226_vm4, %v224_v51, %v225_v45 }
 0x1a5   : > { %v220_v62 = vsel %vm205_vm5, %v219_v56, %v211_v60  ;;  %v234_v63 = vsel %vm223_vm6, %v219_v56, %v228_v61  ;;  %v243_v0 = vsel %vm205_vm5, %v242_v57, %v238_v54  ;;  %v250_v1 = vsel %vm223_vm6, %v242_v57, %v248_v58 }
 0x1a6   : > { %v253_v2 = vadd.f32 %v251_v52, %v220_v62  ;;  %v256_v3 = vadd.f32 %v254_v59, %v234_v63  ;;  %v257_v4 = vsub.f32 %v243_v0, %v247_v55  ;;  %v258_v5 = vsub.f32 %v237_v53, %v250_v1 }
 0x1a8   : > { %v255_v7 = vadd.f32 %v253_v2, %v227_v6  ;;  %v260_v8 = vand.u32 2147483647, %v256_v3  ;;  %v262_v9 = vand.u32 2147483647, %v258_v5  ;;  %v261_v11 = vand.u32 2147483647, %v257_v4 }
 0x1aa   : > { %v259_v10 = vand.u32 2147483647, %v255_v7  ;;  %v264_v12 = vadd.f32 %v262_v9, %v260_v8 }
 0x1ac   : > { %v263_v13 = vadd.f32 %v261_v11, %v259_v10  ;;  %267 = vst.msk [vmem:[%s134_s29 + $0x8] sm:$0xff] %vm265_vm7, %v264_v12 }
 0x1ae   : > { %266 = vst.msk [vmem:[%s134_s29] sm:$0xff] %vm265_vm7, %v263_v13 }
 0x1af   : > { %468 = shalt.err (!%p465_p2)
}
 0x1b0   : > { %s469_s20 = scalar_lea.hbm %s685_s5, 256  ;;  %s473_s24 = scalar_lea.hbm %s732_s1, 512 }
 0x1b1   : > { %p470_p4 = scmp.ne.s32.totalorder %s685_s5, %s469_s20  ;;  %p474_p9 = scmp.lt.u32.totalorder %s685_s5, %s732_s1 }
 0x1b2   : > { %p475_p1 = scmp.lt.u32.totalorder %s473_s24, %s469_s20  ;;  %p477_p6 = scmp.lt.u32.totalorder %s469_s20, %s685_s5 }
 0x1b3   : > { %p471_p5 = pnand %p470_p4, %p739_p11 }
 0x1b4   : > { %p476_p3 = por %p475_p1, %p474_p9 }
 0x1b5   : > { %p472_p7 = pneg %p471_p5 }
 0x1b6   : > { %p478_p12 = por %p477_p6, %p476_p3 }
 0x1b8   : > { %p479_p13 = pnand %p478_p12, %p472_p7 }
 0x1ba   : > { %482 = shalt.err (!%p479_p13)
}
 0x1bb   : > { %s531_s25 = smov 128   ;;  %s532_s17 = smov 8  }
 0x1bc   : > { %373 = dma.vmem_to_hbm [thread:$0]  (%p739_p11), %s687_s2, 256, %s685_s5, %s269_s10, %s531_s25, %s531_s25, %s532_s17  }
 0x1bd PF: > { %s297_s27 = sand.u32 1, %s509_s6   ;;  %p740_p8 = scmp.ne.s32.totalorder %s737_s19, 0 }
 0x1be   : > { %p741_p10 = scmp.ge.s32.totalorder %s521_s9, 2  ;;  %s298_s28 = scalar_lea.sflag [#allocation4], %s297_s27 }
 0x1c0   : > { %p380_p0 = pnand %p741_p10, %p740_p8 }
 0x1c2   : > { %504 = dma.done.wait (!%p380_p0), %s298_s28, 256  }
 0x1c3   : > { %506 = vsyncadd (!%p380_p0), %s298_s28, 4294967040  ;;  %p14_p2 = scmp.ge.s32.totalorder %s568_s12, 4   ;;  %s742_s6 = smov %s513_s7 }
 0x1c4   : > { %s743_s7 = smov %s517_s8  ;;  %s744_s8 = smov %s580_s15 }
 0x1c5   : > { %s745_s9 = smov %s568_s12  ;;  %16 = sbr.rel (!%p14_p2) target bundleno = 5 (0x5), region = 69 }
 0x1cc   :  { %303 = vsyncpa [#allocation3], 1 }
 0x1cd   :  { %305 = vsyncpa [#allocation3 + $0x1], 1 }
 0x1ce   :  { %306 = vsyncpa [#allocation4], 1 }
 0x1cf   :  { %308 = vsyncpa [#allocation4 + $0x1], 1 }

</bundles_post_ra>
